<compile_context>
chip_gen: v6e
topology: v6e:2x2x1
jax: 0.10.0
libtpu: 0.0.40
codegen_flags: <defaults>
</compile_context>

<pallas_src>
import jax
import jax.numpy as jnp
from jax.experimental import pallas as pl
from jax.experimental.pallas import tpu as pltpu


def make_hashtable_kernel(meanings_per_type: int):
    def kernel(meanings_ref, table_oh_ref, out_ref):
        # meanings_ref: [T, block_n] int32          (samples on the 128-lane axis)
        # table_oh_ref: [utt_len*V1, table_size] bf16 (fused table one-hot, VMEM-resident)
        # out_ref:      [utt_len*V1, block_n] float32 (lane-dense output, straight off MXU)
        m = meanings_ref[...]
        T, bn = m.shape
        table_size = table_oh_ref.shape[1]

        # --- polynomial hash: key[n] = sum_t m[t, n] * P^(T-1-t) (lane-dense row reads) ---
        key = jnp.zeros((1, bn), dtype=jnp.int32)
        for t in range(T):  # T is tiny and static
            key = key * jnp.int32(meanings_per_type) + m[t:t + 1, :]

        # --- key one-hot [table_size, block_n]; 0/1 values -> bf16 exact ------------------
        row_iota = jax.lax.broadcasted_iota(jnp.int32, (table_size, bn), 0)
        key_onehot = (row_iota == key).astype(jnp.bfloat16)

        # --- fused gather + vocab one-hot in one MXU matmul --------------------------------
        # out[l*V1 + v, n] = table_oh[l*V1 + v, key[n]] = (table[key[n], l] == v)
        out_ref[...] = jnp.dot(table_oh_ref[...], key_onehot,
                               preferred_element_type=jnp.float32)

    return kernel


def hashtable_forward(meanings, table, *, utt_len, vocab_size, meanings_per_type,
                      block_n=512):
    """meanings: [N, T] int32, table: [table_size, utt_len] float32 (token ids).

    Returns [utt_len, N, vocab_size + 1] float32, matching the PyTorch module.
    """
    N, T = meanings.shape
    table_size = table.shape[0]
    V1 = vocab_size + 1
    assert meanings_per_type ** T <= 2**31 - 1, "int32 key would overflow"
    assert table_size == meanings_per_type ** T

    # Keep at least 2 grid steps when N allows it so the "parallel" grid axis can shard
    # across v7x's two TensorCores; otherwise keep blocks lane-aligned at 128.
    block_n = max(128, min(block_n, 128 * max(1, pl.cdiv(N, 256))))

    n_blocks = pl.cdiv(N, block_n)
    n_pad = n_blocks * block_n

    # Lane-dense meanings: samples N on the 128-lane axis.
    meanings_t = jnp.transpose(meanings.astype(jnp.int32))              # [T, N]
    meanings_t = jnp.pad(meanings_t, ((0, 0), (0, n_pad - N)))          # [T, n_pad]

    # Fused table one-hot: table_oh[l*V1 + v, k] = (int(table[k, l]) == v), bf16 (exact 0/1).
    table_int_t = jnp.round(table).astype(jnp.int32).T                  # [utt_len, table_size]
    v_ids = jnp.arange(V1, dtype=jnp.int32)
    table_oh = (table_int_t[:, None, :] == v_ids[None, :, None])        # [utt_len, V1, ts]
    table_oh = table_oh.reshape(utt_len * V1, table_size).astype(jnp.bfloat16)

    kernel = make_hashtable_kernel(meanings_per_type)
    out2d = pl.pallas_call(
        kernel,
        out_shape=jax.ShapeDtypeStruct((utt_len * V1, n_pad), jnp.float32),
        grid_spec=pltpu.PrefetchScalarGridSpec(
            num_scalar_prefetch=0,
            grid=(n_blocks,),
            in_specs=[
                # meanings tile follows the N grid axis.
                pl.BlockSpec((T, block_n), lambda i: (0, i)),
                # small fused table one-hot stays resident in VMEM across all grid steps.
                pl.BlockSpec((utt_len * V1, table_size), lambda i: (0, 0)),
            ],
            out_specs=pl.BlockSpec((utt_len * V1, block_n), lambda i: (0, i)),
        ),
        compiler_params=pltpu.CompilerParams(
            dimension_semantics=("parallel",),   # shards grid steps across TCs on v7x
        ),
    )(meanings_t, table_oh)

    # Layout plumbing back to the module's [utt_len, N, V1] contract (outside the kernel).
    # If the consumer accepts the lane-dense [utt_len, V1, N] layout, skip this transpose.
    out = out2d.reshape(utt_len, V1, n_pad)
    return jnp.transpose(out, (0, 2, 1))[:, :N, :]


def reference_forward(meanings, table, *, utt_len, vocab_size, meanings_per_type):
    """Pure-JAX reference reproducing the PyTorch forward."""
    N, T = meanings.shape
    key = jnp.zeros((N,), jnp.int32)
    for t in range(T):
        key = key * meanings_per_type + meanings[:, t]
    utts = jnp.round(table[key]).astype(jnp.int32)          # [N, utt_len]
    utts = utts.T                                            # [utt_len, N]
    return jax.nn.one_hot(utts, vocab_size + 1, dtype=jnp.float32)


if __name__ == "__main__":
    # Small, module-consistent sizes.
    embedding_size = 32          # unused by forward (kept for signature parity)
    vocab_size = 4
    utt_len = 8
    num_meaning_types = 3        # == T
    meanings_per_type = 4
    N = 200                      # non-multiple of 128 -> exercises padding + 2-step grid

    table_size = meanings_per_type ** num_meaning_types     # 64 possible meaning keys

    root = jax.random.PRNGKey(0)
    k_meanings, k_table, k_mask = jax.random.split(root, 3)

    # Input meanings: [N, T] ints in [0, meanings_per_type).
    meanings = jax.random.randint(
        k_meanings, (N, num_meaning_types), 0, meanings_per_type, dtype=jnp.int32)

    # Deterministic "trained" hashtable: some meanings have stored utterances
    # (tokens in [1, vocab_size]), others are absent -> zero row -> one-hot index 0.
    full_table = jax.random.randint(
        k_table, (table_size, utt_len), 1, vocab_size + 1, dtype=jnp.int32)
    present = (jax.random.uniform(k_mask, (table_size, 1)) < 0.5)
    table = jnp.where(present, full_table, 0).astype(jnp.float32)

    out = hashtable_forward(
        meanings, table,
        utt_len=utt_len, vocab_size=vocab_size, meanings_per_type=meanings_per_type)
    out = jax.block_until_ready(out)

    ref = reference_forward(
        meanings, table,
        utt_len=utt_len, vocab_size=vocab_size, meanings_per_type=meanings_per_type)

    assert out.shape == (utt_len, N, vocab_size + 1)
    assert jnp.allclose(out, ref), "Pallas kernel mismatch vs reference"
    print("KERNEL_OK")
</pallas_src>

<mosaic_0001>
module attributes {stable_mosaic.version = 11 : i64} {
  func.func @kernel(%arg0: i32, %arg1: memref<3x128xi32, #tpu.memory_space<vmem>>, %arg2: memref<40x64xbf16, #tpu.memory_space<vmem>>, %arg3: memref<40x128xf32, #tpu.memory_space<vmem>>) attributes {dimension_semantics = [#tpu.dimension_semantics<parallel>], iteration_bounds = array<i64: 2>, scalar_prefetch = 0 : i64, scratch_operands = 0 : i64, tpu.core_type = #tpu.core_type<tc>, window_params = [{transform_indices = @transform_0, window_bounds = array<i64: 3, 128>}, {pipeline_mode = #tpu.pipeline_mode<synchronous>, transform_indices = @transform_1, window_bounds = array<i64: 40, 64>}, {transform_indices = @transform_2, window_bounds = array<i64: 40, 128>}]} {
    %c0 = arith.constant 0 : index
    %c0_0 = arith.constant 0 : index
    %0 = vector.load %arg1[%c0, %c0_0] : memref<3x128xi32, #tpu.memory_space<vmem>>, vector<3x128xi32>
    %c0_i32 = arith.constant 0 : i32
    %1 = vector.broadcast %c0_i32 : i32 to vector<1x128xi32>
    %c4_i32 = arith.constant 4 : i32
    %2 = vector.broadcast %c4_i32 : i32 to vector<1x128xi32>
    %3 = arith.muli %1, %2 : vector<1x128xi32>
    %4 = vector.extract_strided_slice %0 {offsets = [0, 0], sizes = [1, 128], strides = [1, 1]} : vector<3x128xi32> to vector<1x128xi32>
    %5 = arith.addi %3, %4 : vector<1x128xi32>
    %c4_i32_1 = arith.constant 4 : i32
    %6 = vector.broadcast %c4_i32_1 : i32 to vector<1x128xi32>
    %7 = arith.muli %5, %6 : vector<1x128xi32>
    %8 = vector.extract_strided_slice %0 {offsets = [1, 0], sizes = [1, 128], strides = [1, 1]} : vector<3x128xi32> to vector<1x128xi32>
    %9 = arith.addi %7, %8 : vector<1x128xi32>
    %c4_i32_2 = arith.constant 4 : i32
    %10 = vector.broadcast %c4_i32_2 : i32 to vector<1x128xi32>
    %11 = arith.muli %9, %10 : vector<1x128xi32>
    %12 = vector.extract_strided_slice %0 {offsets = [2, 0], sizes = [1, 128], strides = [1, 1]} : vector<3x128xi32> to vector<1x128xi32>
    %13 = arith.addi %11, %12 : vector<1x128xi32>
    %14 = tpu.iota {dimensions = array<i32: 0>} : vector<64x128xi32>
    %15 = vector.broadcast %13 : vector<1x128xi32> to vector<64x128xi32>
    %16 = arith.cmpi eq, %14, %15 : vector<64x128xi32>
    %17 = arith.extui %16 : vector<64x128xi1> to vector<64x128xi32>
    %18 = arith.sitofp %17 : vector<64x128xi32> to vector<64x128xf32>
    %19 = arith.truncf %18 : vector<64x128xf32> to vector<64x128xbf16>
    %c0_3 = arith.constant 0 : index
    %c0_4 = arith.constant 0 : index
    %20 = vector.load %arg2[%c0_3, %c0_4] : memref<40x64xbf16, #tpu.memory_space<vmem>>, vector<40x64xbf16>
    %cst = arith.constant dense<0.000000e+00> : vector<40x128xf32>
    %21 = tpu.matmul %20, %19, %cst {dimension_numbers = #tpu.dot_dimension_numbers<[1], [0], [0], [1], [0, 0, 1, 1], [], []>} : vector<40x64xbf16>, vector<64x128xbf16>, vector<40x128xf32> -> vector<40x128xf32>
    %c0_5 = arith.constant 0 : index
    %c0_6 = arith.constant 0 : index
    %22 = vector.load %arg3[%c0_5, %c0_6] : memref<40x128xf32, #tpu.memory_space<vmem>>, vector<40x128xf32>
    tpu.vector_store %arg3[%c0_5, %c0_6], %21 {strides = array<i32>} : memref<40x128xf32, #tpu.memory_space<vmem>>, vector<40x128xf32>,
    return
  }
  func.func @transform_0(%arg0: i32) -> (i32, i32) {
    %c0_i32 = arith.constant 0 : i32
    %c0_i32_0 = arith.constant 0 : i32
    return %c0_i32, %arg0 : i32, i32
  }
  func.func @transform_1(%arg0: i32) -> (i32, i32) {
    %c0_i32 = arith.constant 0 : i32
    %c0_i32_0 = arith.constant 0 : i32
    %c0_i32_1 = arith.constant 0 : i32
    return %c0_i32, %c0_i32_0 : i32, i32
  }
  func.func @transform_2(%arg0: i32) -> (i32, i32) {
    %c0_i32 = arith.constant 0 : i32
    %c0_i32_0 = arith.constant 0 : i32
    return %c0_i32, %arg0 : i32, i32
  }
}

</mosaic_0001>

<bundles_post_ra>
// kernel: tpu_custom_call.1
= control target key start
LH: loop header
LB: loop body
LE: loop exit
PB: predicated region body
PF: predicated region fallthrough
CT: control target
= control target key end

     0   :  { %7 = vsyncpa [#allocation3], 0  ;;  %s868_s0 = inlined_call_operand.hbm [shape: s32[3,256], index: 0, kind: input, shape index: {}]   ;;  %s869_s1 = inlined_call_operand.hbm [shape: bf16[40,64], index: 1, kind: input, shape index: {}]   ;;  %s870_s2 = inlined_call_operand.hbm [shape: f32[40,256], index: 2, kind: output, shape index: {}]  }
   0x1   :  { %9 = vsyncpa [#allocation3 + $0x1], 0 }
   0x2   :  { %10 = vsyncpa [#allocation6], 0 }
   0x3   :  { %11 = vsyncpa [#allocation4], 0 }
   0x4   :  { %13 = vsyncpa [#allocation4 + $0x1], 0  ;;  %s696_s9 = smov 0   ;;  %s698_s10 = smov 0  }
   0x5   :  { %s700_s11 = smov 0   ;;  %s702_s12 = smov 0  }
   0x6 LB: > { %s717_s13 = sadd.s32 4294967295, %s668_s12   ;;  %s408_s14 = sadd.s32 4294967294, %s668_s12   ;;  %s668_s12 = sphi %s702_s12, %s892_s12   ;;  %s664_s11 = sphi %s700_s11, %s891_s11   ;;  %s660_s10 = sphi %s698_s10, %s890_s10   ;;  %s656_s9 = sphi %s696_s9, %s889_s9  }
   0x7   : > { %p39_p0 = scmp.ne.s32.totalorder %s660_s10, %s656_s9  ;;  %p871_p1 = scmp.eq.s32.totalorder %s717_s13, 0 }
   0x8   : > { %p90_p3 = scmp.eq.s32.totalorder %s408_s14, 1  ;;  %p409_p5 = scmp.ge.s32.totalorder %s668_s12, 1 }
   0x9   : > { %p726_p4 = por %p871_p1, %p39_p0  ;;  %p97_p7 = scmp.lt.s32.totalorder %s668_s12, 3 }
   0xa   : > { %p731_p6 = por %p90_p3, %p39_p0  ;;  %s670_s18 = smov [#allocation5]  }
   0xb   : > { %s875_s15 = scalar_select %p726_p4, 1, 0 }
   0xc   : > { %s876_s16 = scalar_select %p731_p6, 1, 0 }
   0xd   : > { %p736_p8 = pnand %p409_p5, %p97_p7  ;;  %s109_s19 = sshll.u32 %s670_s18, 4  ;;  %s110_s19 = int_to_ptr.vmem [resolvable:$true] %s109_s19 }
   0xe   : > { %s750_s21 = sadd.s32 1, %s668_s12   ;;  %s26_s22 = sadd.s32 1, %s664_s11 }
   0xf   : > { %s877_s17 = scalar_select %p736_p8, 1, 0 }
  0x10   : > { %p486_p9 = pneg %p736_p8  ;;  %s23_s23 = ssub.s32 %s668_s12, %s750_s21 }
  0x11   : > { %s557_s24 = scalar_lea.vmem %s110_s19, 320  ;;  %p565_p5 = scmp.lt.s32.totalorder %s110_s19, %s110_s19 }
  0x12   : > { %p745_p11 = pnand %p486_p9, %p871_p1  ;;  %p558_p13 = scmp.ne.s32.totalorder %s110_s19, %s557_s24 }
  0x13   : > { %p566_p7 = scmp.lt.s32.totalorder %s557_s24, %s557_s24 }
  0x14   : > { %p548_p12 = pneg %p745_p11 }
  0x15   : > { %p567_p10 = por %p566_p7, %p565_p5 }
  0x16   : > { %p560_p0 = pnand %p558_p13, %p548_p12 }
  0x18   : > { %p561_p3 = pneg %p560_p0 }
  0x1a   : > { %p568_p2 = pnand %p567_p10, %p561_p3 }
  0x1c   : > { %571 = shalt.err (!%p568_p2)
}
  0x1d   : > { %s671_s25 = smov 64   ;;  %s672_s26 = smov 4  }
  0x1e   : > { %489 = dma.hbm_to_vmem [thread:$0]  (!%p745_p11), %s869_s1, 320, %s110_s19, [#allocation6], %s671_s25, %s671_s25, %s672_s26  }
  0x1f   : > { %p24_p9 = scmp.eq.s32.totalorder %s23_s23, 0  ;;  %p33_p12 = scmp.ne.s32.totalorder %s664_s11, %s660_s10 }
  0x20   : > { %p34_p10 = scmp.eq.s32.totalorder %s668_s12, 0  ;;  %p499_p2 = scmp.lt.s32.totalorder %s668_s12, 2 }
  0x21   : > { %s767_s29 = scalar_select %p24_p9, %s664_s11, %s26_s22  }
  0x22   : > { %p35_p13 = por %p34_p10, %p33_p12  ;;  %p879_p0 = scmp.eq.s32.totalorder %s717_s13, 1 }
  0x23   : > { %s123_s3 = sand.u32 1, %s664_s11   ;;  %s413_s4 = sshll.u32 %s668_s12, 6 }
  0x24   : > { %p771_p3 = por %p879_p0, %p33_p12  ;;  %s412_s5 = sshll.u32 %s123_s3, 2 }
  0x25   : > { %s780_s8 = scalar_lea.hbm %s868_s0, %s413_s4  ;;  %s127_s14 = scalar_lea.vmem [#allocation2], %s412_s5 }
  0x26   : > { %s880_s30 = scalar_select %p771_p3, 1, 0 }
  0x27   : > { %s134_s18 = sshll.u32 %s127_s14, 4  ;;  %p782_p11 = pnand %p499_p2, %p35_p13  ;;  %s135_s18 = int_to_ptr.vmem [resolvable:$true] %s134_s18 }
  0x28   : > { %s124_s20 = scalar_lea.sflag [#allocation3], %s123_s3  ;;  %s572_s22 = scalar_lea.hbm %s780_s8, 64 }
  0x29   : > { %p573_p5 = scmp.ne.s32.totalorder %s780_s8, %s572_s22  ;;  %p574_p7 = pneg %p782_p11 }
  0x2a   : > { %s577_s25 = scalar_lea.hbm %s868_s0, 128  ;;  %p578_p10 = scmp.lt.s32.totalorder %s780_s8, %s868_s0 }
  0x2b   : > { %p575_p9 = pnand %p574_p7, %p573_p5  ;;  %p579_p2 = scmp.lt.s32.totalorder %s577_s25, %s572_s22 }
  0x2d   : > { %p576_p12 = pneg %p575_p9  ;;  %p580_p13 = por %p579_p2, %p578_p10 }
  0x2f   : > { %p581_p0 = pnand %p580_p13, %p576_p12 }
  0x31   : > { %584 = shalt.err (!%p581_p0)
}
  0x32   : > { %s585_s28 = scalar_lea.vmem %s135_s18, 64  ;;  %s673_s3 = smov [#allocation2]  }
  0x33   : > { %p586_p1 = scmp.ne.s32.totalorder %s135_s18, %s585_s28  ;;  %s590_s4 = sshll.u32 %s673_s3, 4  ;;  %s591_s4 = int_to_ptr.vmem [resolvable:$false] %s590_s4 }
  0x34   : > { %s592_s5 = scalar_lea.vmem %s591_s4, 128  ;;  %p593_p5 = scmp.lt.s32.totalorder %s135_s18, %s591_s4 }
  0x35   : > { %p588_p6 = pnand %p586_p1, %p574_p7  ;;  %p594_p9 = scmp.lt.s32.totalorder %s592_s5, %s585_s28 }
  0x37   : > { %p589_p3 = pneg %p588_p6  ;;  %p595_p4 = por %p594_p9, %p593_p5 }
  0x39   : > { %p596_p8 = pnand %p595_p4, %p589_p3 }
  0x3b   : > { %599 = shalt.err (!%p596_p8)
}
  0x3c   : > { %493 = dma.hbm_to_vmem [thread:$0]  (!%p782_p11), %s780_s8, 64, %s135_s18, %s124_s20  }
  0x3d   : > { %p882_p12 = scmp.ne.s32.totalorder %s877_s17, 0 }
  0x3e   : > { %s803_s6 = sand.u32 (!%p882_p12), 1, %s660_s10   ;;  %p883_p1 = scmp.ne.s32.totalorder (!%p882_p12), %s875_s15, 0 }
  0x3f   : > { %143 = sbr.rel (%p882_p12) target bundleno = 317 (0x13d), region = 28  ;;  %s415_s7 = sshll.u32 (!%p882_p12), %s803_s6, 2 }
  0x40   : > { %s146_s14 = scalar_lea.sflag (!%p882_p12), [#allocation3], %s803_s6  ;;  %s149_s22 = scalar_lea.vmem (!%p882_p12), [#allocation2], %s415_s7 }
  0x44   : > { %643 = dma.done.wait (%p883_p1), %s146_s14, 64  }
  0x45   : > { %645 = vsyncadd (%p883_p1), %s146_s14, 4294967232  ;;  %p884_p4 = scmp.eq.s32.totalorder %s717_s13, 0 }
  0x47   : > { %647 = dma.done.wait (%p884_p4), [#allocation6], 320   ;;  %p885_p6 = pmov %p884_p4 }
  0x48   : > { %v674_v0 = vmov 0.0   ;;  %vm675_vm0 = vmmov 0   ;;  %v182_v1 = vlaneseq  ;;  %v175_v2 = vld [vmem:[%s149_s22] sm:$0x7]  ;;  %v676_v18 = vmov 1.0|1.0  }
  0x49   : > { %649 = vsyncadd (%p885_p6), [#allocation6], 4294966976  ;;  %469 = vmatprep.subr.bf16.mxu1 %v674_v0  ;;  %449 = vmatprep.subr.bf16.mxu0 %v674_v0  ;;  %v176_v3 = vmul.u32 4, %v175_v2  ;;  %v177_v4 = vrot.slane %v175_v2, 1  ;;  %v180_v7 = vrot.slane %v175_v2, 2  ;;  %v543_v20 = vld [vmem:[#allocation5 + $0x8] sm:$0xff]  }
  0x4a   : > { %461 = vmatprep.mubr.msk.bf16.mxu1 %vm675_vm0, %v674_v0  ;;  %457 = vmatprep.mubr.msk.bf16.mxu0 %vm675_vm0, %v674_v0  ;;  %v183_v5 = vshrl.u32 %v182_v1, 7  ;;  %v544_v21 = vld [vmem:[#allocation5] sm:$0xff]   ;;  %vm241_vm13 = vcmask 523264   ;;  %v545_v22 = vld [vmem:[#allocation5 + $0x10] ss:$0 sps:$4 sm:$0xff]   ;;  %s477_s15 = smul.u32 40, %s803_s6 }
  0x4b   : > { %v178_v6 = vadd.s32 %v177_v4, %v176_v3  ;;  %s439_s18 = sshll.u32 %s717_s13, 7  ;;  %s313_s13 = scalar_lea.sflag [#allocation4], %s803_s6 }
  0x4c   : > { %v193_v9 = vsub.s32 0, %v183_v5  ;;  %v189_v10 = vadd.s32 48, %v183_v5  ;;  %v190_v12 = vadd.s32 56, %v183_v5  ;;  %v187_v13 = vadd.s32 32, %v183_v5  ;;  %s173_s17 = scalar_lea.vmem [#allocation7], %s477_s15  ;;  %s825_s23 = scalar_lea.hbm %s870_s2, %s439_s18 }
  0x4d   : > { %v179_v8 = vmul.u32 4, %v178_v6  ;;  %v188_v14 = vadd.s32 40, %v183_v5  ;;  %v185_v16 = vadd.s32 16, %v183_v5  ;;  %v186_v17 = vadd.s32 24, %v183_v5  ;;  %s325_s8 = sshll.u32 %s173_s17, 4  ;;  %p886_p3 = scmp.ne.s32.totalorder %s880_s30, 0  ;;  %s820_s8 = int_to_ptr.vmem [resolvable:$true] %s325_s8 }
  0x4e   : > { %v184_v19 = vadd.s32 8, %v183_v5  ;;  %s600_s24 = scalar_lea.vmem %s820_s8, 640  ;;  %s677_s25 = smov [#allocation7]  }
  0x4f   : > { %v181_v11 = vadd.s32 %v180_v7, %v179_v8  ;;  %p601_p8 = scmp.ne.s32.totalorder %s820_s8, %s600_s24  ;;  %s604_s26 = sshll.u32 %s677_s25, 4  ;;  %s605_s26 = int_to_ptr.vmem [resolvable:$false] %s604_s26 }
  0x50   : > { %s606_s27 = scalar_lea.vmem %s605_s26, 1280  ;;  %p607_p10 = scmp.lt.s32.totalorder %s820_s8, %s605_s26 }
  0x51   : > { %v194_v15 = vrot.slane %v181_v11, %v193_v9  ;;  %p602_p11 = pnand %p601_p8, %p886_p3  ;;  %p608_p2 = scmp.lt.s32.totalorder %s606_s27, %s600_s24 }
  0x53   : > { %vm201_vm1 = vcmp.eq.s32.totalorder %v189_v10, %v194_v15  ;;  %vm202_vm2 = vcmp.eq.s32.totalorder %v190_v12, %v194_v15  ;;  %vm199_vm3 = vcmp.eq.s32.totalorder %v187_v13, %v194_v15  ;;  %vm200_vm4 = vcmp.eq.s32.totalorder %v188_v14, %v194_v15  ;;  %p603_p7 = pneg %p602_p11  ;;  %p609_p13 = por %p608_p2, %p607_p10 }
  0x54   : > { %vm428_vm5 = vmpackc.low %vm202_vm2, %vm201_vm1  ;;  %vm197_vm7 = vcmp.eq.s32.totalorder %v185_v16, %v194_v15  ;;  %vm198_vm8 = vcmp.eq.s32.totalorder %v186_v17, %v194_v15  ;;  %vm195_vm10 = vcmp.eq.s32.totalorder %v183_v5, %v194_v15  ;;  %vm196_vm11 = vcmp.eq.s32.totalorder %v184_v19, %v194_v15 }
  0x55   : > { %473 = vmatpush3.bf16.msk.msra.mxu1 %vm428_vm5, %v676_v18  ;;  %450 = vmatpush3.bf16.msk.msra.mxu0 %vm428_vm5, %v676_v18  ;;  %vm430_vm6 = vmpackc.low %vm200_vm4, %vm199_vm3  ;;  %p610_p0 = pnand %p609_p13, %p603_p7 }
  0x56   : > { %470 = vmatprep.subr.bf16.mxu1 %v674_v0  ;;  %451 = vmatprep.subr.bf16.mxu0 %v674_v0  ;;  %vm432_vm9 = vmpackc.low %vm198_vm8, %vm197_vm7 }
  0x57   : > { %vm434_vm12 = vmpackc.low %vm196_vm11, %vm195_vm10 }
  0x59   : > { %474 = vmatpush3.bf16.msk.msra.mxu1 %vm430_vm6, %v676_v18  ;;  %452 = vmatpush3.bf16.msk.msra.mxu0 %vm430_vm6, %v676_v18 }
  0x5a   : > { %471 = vmatprep.subr.bf16.mxu1 %v674_v0  ;;  %453 = vmatprep.subr.bf16.mxu0 %v674_v0 }
  0x5d   : > { %475 = vmatpush3.bf16.msk.msra.mxu1 %vm432_vm9, %v676_v18  ;;  %454 = vmatpush3.bf16.msk.msra.mxu0 %vm432_vm9, %v676_v18 }
  0x5e   : > { %472 = vmatprep.subr.bf16.mxu1 %v674_v0  ;;  %455 = vmatprep.subr.bf16.mxu0 %v674_v0 }
  0x61   : > { %476 = vmatpush3.bf16.msk.msra.mxu1 %vm434_vm12, %v676_v18  ;;  %456 = vmatpush3.bf16.msk.msra.mxu0 %vm434_vm12, %v676_v18 }
  0x64   : > { %462 = vmatmul.mubr.msk.bf16.vlgmr.msra.gmra.mxu1 %vm241_vm13, %v543_v20  ;;  %458 = vmatmul.mubr.msk.bf16.vlgmr.msra.gmra.mxu0 %vm241_vm13, %v544_v21 }
  0x65   : > { %465 = vmatprep.mubr.msk.bf16.mxu1 %vm675_vm0, %v674_v0 }
  0x6c   : > { %466 = vmatmul.mubr.msk.bf16.gmra.mxu1 %vm241_vm13, %v545_v22 }
 0x124   : > { %v293_v23 = vpop.f32.mrf.mxu1  ;;  %v285_v24 = vpop.f32.mrf.mxu0 }
 0x125   : > { %309 = vst [vmem:[%s173_s17 + $0x10] sm:$0xff] %v293_v23  ;;  %307 = vst [vmem:[%s173_s17] sm:$0xff] %v285_v24 }
 0x126   : > { %v463_v25 = vpop.f32.mrf.mxu1  ;;  %v459_v26 = vpop.f32.mrf.mxu0 }
 0x128   : > { %v296_v27 = vpop.f32.mrf.mxu1  ;;  %v288_v28 = vpop.f32.mrf.mxu0 }
 0x129   : > { %310 = vst [vmem:[%s173_s17 + $0x18] sm:$0xff] %v296_v27  ;;  %308 = vst [vmem:[%s173_s17 + $0x8] sm:$0xff] %v288_v28 }
 0x12a   : > { %v464_v29 = vpop.f32.mrf.mxu1  ;;  %v460_v30 = vpop.f32.mrf.mxu0 }
 0x12c   : > { %v301_v31 = vpop.f32.mrf.mxu1 }
 0x12d   : > { %311 = vst [vmem:[%s173_s17 + $0x20] sm:$0xff] %v301_v31 }
 0x12e   : > { %v467_v32 = vpop.f32.mrf.mxu1 }
 0x12f   : > { %613 = shalt.err (!%p610_p0)
}
 0x130   : > { %s614_s28 = scalar_lea.hbm %s825_s23, 640  ;;  %s618_s5 = scalar_lea.hbm %s870_s2, 1280 }
 0x131   : > { %p615_p5 = scmp.ne.s32.totalorder %s825_s23, %s614_s28  ;;  %p619_p1 = scmp.lt.s32.totalorder %s825_s23, %s870_s2 }
 0x132   : > { %p620_p4 = scmp.lt.s32.totalorder %s618_s5, %s614_s28 }
 0x133   : > { %p616_p9 = pnand %p615_p5, %p886_p3 }
 0x134   : > { %p621_p6 = por %p620_p4, %p619_p1 }
 0x135   : > { %p617_p12 = pneg %p616_p9 }
 0x137   : > { %p622_p8 = pnand %p621_p6, %p617_p12 }
 0x139   : > { %625 = shalt.err (!%p622_p8)
}
 0x13a   : > { %s678_s22 = smov 128   ;;  %s679_s15 = smov 256   ;;  %v304_v33 = vpop.f32.mrf.mxu1 }
 0x13b   : > { %s680_s17 = smov 8  }
 0x13c   : > { %484 = dma.vmem_to_hbm [thread:$0]  (%p886_p3), %s820_s8, 640, %s825_s23, %s313_s13, %s678_s22, %s679_s15, %s680_s17   ;;  %v468_v34 = vpop.f32.mrf.mxu1 }
 0x13d PF: > { %s340_s18 = sand.u32 1, %s656_s9   ;;  %p887_p11 = scmp.ne.s32.totalorder %s876_s16, 0 }
 0x13e   : > { %p888_p7 = scmp.ge.s32.totalorder %s668_s12, 2  ;;  %s341_s19 = scalar_lea.sflag [#allocation4], %s340_s18 }
 0x140   : > { %p495_p10 = pnand %p888_p7, %p887_p11 }
 0x142   : > { %p496_p2 = pneg %p495_p10 }
 0x144   : > { %651 = dma.done.wait (%p496_p2), %s341_s19, 640  }
 0x145   : > { %653 = vsyncadd (%p496_p2), %s341_s19, 4294966656  ;;  %p16_p3 = scmp.ge.s32.totalorder %s750_s21, 4   ;;  %s889_s9 = smov %s660_s10 }
 0x146   : > { %s890_s10 = smov %s664_s11  ;;  %s891_s11 = smov %s767_s29 }
 0x147   : > { %s892_s12 = smov %s750_s21  ;;  %18 = sbr.rel (!%p16_p3) target bundleno = 6 (0x6), region = 77 }
 0x14c   :  { %346 = vsyncpa [#allocation3], 1 }
 0x14d   :  { %348 = vsyncpa [#allocation3 + $0x1], 1 }
 0x14e   :  { %349 = vsyncpa [#allocation6], 1 }
 0x14f   :  { %350 = vsyncpa [#allocation4], 1 }
 0x150   :  { %352 = vsyncpa [#allocation4 + $0x1], 1 }

</bundles_post_ra>
